<compile_context>
chip_gen: v5e
topology: v5e:2x2
jax: 0.10.0
libtpu: 0.0.40
codegen_flags: <defaults>
</compile_context>

<pallas_src>
import functools

import jax
import jax.numpy as jnp
from jax import lax
from jax.experimental import pallas as pl
from jax.experimental.pallas import tpu as pltpu


def _round_up(v, m):
    return (v + m - 1) // m * m


# ---------------------------------------------------------------------------
# Generic tiled linear:  out = x @ w + b   (lane-dense output, row-tiled)
# ---------------------------------------------------------------------------
def _linear_kernel(x_ref, w_ref, b_ref, o_ref):
    o_ref[...] = (
        jnp.dot(x_ref[...], w_ref[...], preferred_element_type=jnp.float32)
        + b_ref[...]
    )


def linear_pallas(x, w, b, *, tm=256):
    M, K = x.shape
    N = w.shape[1]
    tm = min(tm, _round_up(M, 8))
    M_pad = _round_up(M, tm)
    if M_pad != M:
        x = jnp.zeros((M_pad, K), x.dtype).at[:M].set(x)
    out = pl.pallas_call(
        _linear_kernel,
        out_shape=jax.ShapeDtypeStruct((M_pad, N), jnp.float32),
        grid=(M_pad // tm,),
        in_specs=[
            pl.BlockSpec((tm, K), lambda i: (i, 0)),
            pl.BlockSpec((K, N), lambda i: (0, 0)),
            pl.BlockSpec((1, N), lambda i: (0, 0)),
        ],
        out_specs=pl.BlockSpec((tm, N), lambda i: (i, 0)),
        compiler_params=pltpu.CompilerParams(
            dimension_semantics=("parallel",)),
    )(x, w, b)
    return out if M_pad == M else out[:M]


# ---------------------------------------------------------------------------
# Fused GCN layer kernel:
#   h_lin = h @ W + b                (once, into VMEM scratch)
#   agg  += scatter_add(norm_e * relu(h_lin[row_e] + e_emb_e)) over edge tiles
#   out   = BN( agg + relu(h_lin + root) / deg ) [+ relu]
# ---------------------------------------------------------------------------
def _gcn_layer_kernel(row_ref, col_ref, norm_ref,              # SMEM (prefetch)
                      h_ref, w_ref, pack_ref, eemb_ref, deginv_ref,  # VMEM in
                      o_ref,                                   # VMEM out
                      hlin_ref, acc_ref,                       # VMEM scratch
                      *, te, apply_relu, bn_eps):
    k = pl.program_id(0)
    pack = pack_ref[...]                       # rows: bias, root, gamma, beta, mean, var

    @pl.when(k == 0)
    def _init():
        hlin_ref[...] = (
            jnp.dot(h_ref[...], w_ref[...], preferred_element_type=jnp.float32)
            + pack[0:1, :])
        acc_ref[...] = jnp.zeros_like(acc_ref)

    base = k * te

    def edge_body(e, carry):
        idx = base + e
        src = row_ref[idx]                     # source node j
        dst = col_ref[idx]                     # target node i
        nrm = norm_ref[idx]                    # 0.0 for padded edges -> no-op
        x_j = hlin_ref[pl.ds(src, 1), :]       # (1, D_pad) gather
        e_a = eemb_ref[pl.ds(e, 1), :]         # (1, D_pad) edge embedding
        msg = nrm * jnp.maximum(x_j + e_a, 0.0)
        acc_ref[pl.ds(dst, 1), :] = acc_ref[pl.ds(dst, 1), :] + msg   # scatter-add
        return carry

    lax.fori_loop(0, te, edge_body, 0)

    @pl.when(k == pl.num_programs(0) - 1)
    def _finalize():
        hlin = hlin_ref[...]
        root, gamma, beta = pack[1:2, :], pack[2:3, :], pack[3:4, :]
        mean, var = pack[4:5, :], pack[5:6, :]
        out = acc_ref[...] + jnp.maximum(hlin + root, 0.0) * deginv_ref[...]
        out = (out - mean) * lax.rsqrt(var + bn_eps) * gamma + beta   # BN (eval)
        if apply_relu:
            out = jnp.maximum(out, 0.0)
        o_ref[...] = out


def gcn_layer(row_p, col_p, norm_p, h, lin_w, pack, e_emb_all, deginv,
              *, layer, edge_tile, apply_relu, bn_eps=1e-5):
    N_pad, D_pad = h.shape
    E_pad = row_p.shape[0]
    te = edge_tile
    num_tiles = E_pad // te

    kern = functools.partial(_gcn_layer_kernel, te=te,
                             apply_relu=apply_relu, bn_eps=bn_eps)

    vmem_est = 4 * (4 * N_pad * D_pad          # h, out, 2 scratch buffers
                    + D_pad * D_pad            # linear weight
                    + 4 * te * D_pad           # double-buffered e_emb tiles
                    + 16 * D_pad + N_pad)
    vmem_limit = int(min(60 * 1024 * 1024,
                         max(32 * 1024 * 1024, 2 * vmem_est + (4 << 20))))

    cost = pl.CostEstimate(
        flops=2 * N_pad * D_pad * D_pad + 8 * E_pad * D_pad + 10 * N_pad * D_pad,
        transcendentals=0,
        bytes_accessed=4 * (2 * N_pad * D_pad + D_pad * D_pad + E_pad * D_pad
                            + 3 * E_pad + N_pad + 8 * D_pad),
    )

    grid_spec = pltpu.PrefetchScalarGridSpec(
        num_scalar_prefetch=3,                 # row, col, norm -> SMEM
        grid=(num_tiles,),                     # edge-tile reduction axis
        in_specs=[
            pl.BlockSpec((N_pad, D_pad), lambda k, r, c, n: (0, 0)),    # h (resident)
            pl.BlockSpec((D_pad, D_pad), lambda k, r, c, n: (0, 0)),    # linear W
            pl.BlockSpec((8, D_pad), lambda k, r, c, n: (0, 0)),        # packed params
            pl.BlockSpec((te, D_pad), lambda k, r, c, n: (k, layer)),   # this layer's e_emb tile
            pl.BlockSpec((N_pad, 1), lambda k, r, c, n: (0, 0)),        # 1/deg
        ],
        out_specs=pl.BlockSpec((N_pad, D_pad), lambda k, r, c, n: (0, 0)),
        scratch_shapes=[pltpu.VMEM((N_pad, D_pad), jnp.float32),   # h_lin
                        pltpu.VMEM((N_pad, D_pad), jnp.float32)],  # aggregation acc
    )

    return pl.pallas_call(
        kern,
        out_shape=jax.ShapeDtypeStruct((N_pad, D_pad), jnp.float32),
        grid_spec=grid_spec,
        compiler_params=pltpu.CompilerParams(
            dimension_semantics=("arbitrary",),
            vmem_limit_bytes=vmem_limit),
        cost_estimate=cost,
    )(row_p, col_p, norm_p, h, lin_w, pack, e_emb_all, deginv)


# ---------------------------------------------------------------------------
# Parameters (weights are stored pre-padded to D_pad = 128-multiple lanes)
# ---------------------------------------------------------------------------
def init_params(key, num_nodefeats, num_edgefeats, emb_dim, num_layer):
    D_pad = _round_up(emb_dim, 128)

    def dense(k, fan_in, fan_out):
        kw, kb = jax.random.split(k)
        scale = (6.0 / (fan_in + fan_out)) ** 0.5       # xavier-uniform-ish
        w = jax.random.uniform(kw, (fan_in, fan_out), jnp.float32, -scale, scale)
        b = jax.random.uniform(kb, (1, fan_out), jnp.float32, -0.1, 0.1)
        return w, b

    keys = jax.random.split(key, 2 + num_layer)

    nw, nb = dense(keys[0], num_nodefeats, emb_dim)
    node_w = jnp.zeros((num_nodefeats, D_pad), jnp.float32).at[:, :emb_dim].set(nw)
    node_b = jnp.zeros((1, D_pad), jnp.float32).at[:, :emb_dim].set(nb)

    # batched edge encoder: one (F_e, L*D_pad) weight, sliced per layer by the
    # layer kernel's BlockSpec index_map.
    edge_w_all = jnp.zeros((num_edgefeats, num_layer * D_pad), jnp.float32)
    edge_b_all = jnp.zeros((1, num_layer * D_pad), jnp.float32)

    layers = []
    for l in range(num_layer):
        k = jax.random.split(keys[2 + l], 3)
        lw, lb = dense(k[0], emb_dim, emb_dim)
        lin_w = jnp.zeros((D_pad, D_pad), jnp.float32).at[:emb_dim, :emb_dim].set(lw)
        ew, eb = dense(k[1], num_edgefeats, emb_dim)
        edge_w_all = edge_w_all.at[:, l * D_pad:l * D_pad + emb_dim].set(ew)
        edge_b_all = edge_b_all.at[:, l * D_pad:l * D_pad + emb_dim].set(eb[0])
        root = jax.random.normal(k[2], (1, emb_dim), jnp.float32) * 0.1

        pack = jnp.zeros((8, D_pad), jnp.float32)
        pack = pack.at[0, :emb_dim].set(lb[0])   # linear bias
        pack = pack.at[1, :emb_dim].set(root[0])  # root embedding
        pack = pack.at[2, :].set(1.0)            # BN gamma
        # row 3: BN beta = 0, row 4: BN running mean = 0
        pack = pack.at[5, :].set(1.0)            # BN running var
        layers.append(dict(lin_w=lin_w, pack=pack))

    return dict(emb_dim=emb_dim, node_enc_w=node_w, node_enc_b=node_b,
                edge_w_all=edge_w_all, edge_b_all=edge_b_all, layers=layers)


# ---------------------------------------------------------------------------
# GNN_node forward (gcn type, eval mode)
# ---------------------------------------------------------------------------
def gnn_node_forward(x, edge_index, edge_attr, params, num_layer, *, edge_tile=128):
    N = x.shape[0]
    E = edge_index.shape[1]
    emb_dim = params["emb_dim"]
    D_pad = params["node_enc_w"].shape[1]

    row = edge_index[0].astype(jnp.int32)
    col = edge_index[1].astype(jnp.int32)

    # GCN normalisation glue (O(N + E))
    deg = jnp.zeros((N,), jnp.float32).at[row].add(1.0) + 1.0
    dis = deg ** -0.5
    norm = dis[row] * dis[col]

    N_pad = _round_up(N, 8)
    te = edge_tile
    E_pad = _round_up(max(E, 1), te)

    row_p = jnp.zeros((E_pad,), jnp.int32).at[:E].set(row)
    col_p = jnp.zeros((E_pad,), jnp.int32).at[:E].set(col)
    norm_p = jnp.zeros((E_pad,), jnp.float32).at[:E].set(norm)   # 0 => padded edge is a no-op
    deginv = jnp.ones((N_pad, 1), jnp.float32).at[:N, 0].set(1.0 / deg)

    # node encoder (x is float -> Linear path of the PyTorch forward)
    x_p = jnp.zeros((N_pad, x.shape[1]), jnp.float32).at[:N].set(x.astype(jnp.float32))
    h = linear_pallas(x_p, params["node_enc_w"], params["node_enc_b"])      # (N_pad, D_pad)

    # edge encoder, batched across all layers in a single matmul
    ea_p = jnp.zeros((E_pad, edge_attr.shape[1]), jnp.float32).at[:E].set(
        edge_attr.astype(jnp.float32))
    e_emb_all = linear_pallas(ea_p, params["edge_w_all"], params["edge_b_all"])  # (E_pad, L*D_pad)

    for layer in range(num_layer):
        p = params["layers"][layer]
        h = gcn_layer(row_p, col_p, norm_p, h, p["lin_w"], p["pack"],
                      e_emb_all, deginv,
                      layer=layer, edge_tile=te,
                      apply_relu=(layer != num_layer - 1))
    return h[:N, :emb_dim]


# ---------------------------------------------------------------------------
# Pure-JAX reference (eval mode) for correctness checking
# ---------------------------------------------------------------------------
def _reference_forward(x, edge_index, edge_attr, params, num_layer):
    emb_dim = params["emb_dim"]
    D_pad = params["node_enc_w"].shape[1]
    row, col = edge_index[0], edge_index[1]
    N = x.shape[0]
    hp = jax.lax.Precision.HIGHEST

    deg = jnp.zeros((N,), jnp.float32).at[row].add(1.0) + 1.0
    dis = deg ** -0.5
    norm = dis[row] * dis[col]

    h = jnp.dot(x, params["node_enc_w"][:, :emb_dim], precision=hp) \
        + params["node_enc_b"][:, :emb_dim]
    for l in range(num_layer):
        p = params["layers"][l]
        pack = p["pack"][:, :emb_dim]
        lin_b, root, gamma, beta, mean, var = (pack[0], pack[1], pack[2],
                                               pack[3], pack[4], pack[5])
        ew = params["edge_w_all"][:, l * D_pad:l * D_pad + emb_dim]
        eb = params["edge_b_all"][:, l * D_pad:l * D_pad + emb_dim]
        e_emb = jnp.dot(edge_attr, ew, precision=hp) + eb
        h_lin = jnp.dot(h, p["lin_w"][:emb_dim, :emb_dim], precision=hp) + lin_b
        msg = norm[:, None] * jnp.maximum(h_lin[row] + e_emb, 0.0)
        agg = jnp.zeros((N, emb_dim), jnp.float32).at[col].add(msg)
        out = agg + jnp.maximum(h_lin + root, 0.0) / deg[:, None]
        out = (out - mean) * jax.lax.rsqrt(var + 1e-5) * gamma + beta
        if l != num_layer - 1:
            out = jnp.maximum(out, 0.0)
        h = out
    return h


if __name__ == "__main__":
    num_nodefeats = 8
    num_edgefeats = 4
    emb_dim = 32
    num_layer = 2
    N, E = 16, 32

    key = jax.random.PRNGKey(0)
    kx, ke, ka, kp = jax.random.split(key, 4)

    x = jax.random.normal(kx, (N, num_nodefeats), jnp.float32)
    edge_index = jax.random.randint(ke, (2, E), 0, N, jnp.int32)
    edge_attr = jax.random.normal(ka, (E, num_edgefeats), jnp.float32)

    params = init_params(kp, num_nodefeats, num_edgefeats, emb_dim, num_layer)

    out = gnn_node_forward(x, edge_index, edge_attr, params, num_layer)
    out = jax.block_until_ready(out)

    assert out.shape == (N, emb_dim)
    assert bool(jnp.all(jnp.isfinite(out)))

    ref = _reference_forward(x, edge_index, edge_attr, params, num_layer)
    max_err = float(jnp.max(jnp.abs(out - ref)))
    assert max_err < 2e-2, f"mismatch vs reference: {max_err}"

    print("KERNEL_OK")
</pallas_src>

<mosaic_0001>
module attributes {stable_mosaic.version = 11 : i64} {
  func.func @_linear_kernel(%arg0: i32, %arg1: memref<16x8xf32, #tpu.memory_space<vmem>>, %arg2: memref<8x128xf32, #tpu.memory_space<vmem>>, %arg3: memref<1x128xf32, #tpu.memory_space<vmem>>, %arg4: memref<16x128xf32, #tpu.memory_space<vmem>>) attributes {dimension_semantics = [#tpu.dimension_semantics<parallel>], iteration_bounds = array<i64: 1>, scalar_prefetch = 0 : i64, scratch_operands = 0 : i64, tpu.core_type = #tpu.core_type<tc>, window_params = [{transform_indices = @transform_0, window_bounds = array<i64: 16, 8>}, {pipeline_mode = #tpu.pipeline_mode<synchronous>, transform_indices = @transform_1, window_bounds = array<i64: 8, 128>}, {pipeline_mode = #tpu.pipeline_mode<synchronous>, transform_indices = @transform_2, window_bounds = array<i64: 1, 128>}, {transform_indices = @transform_3, window_bounds = array<i64: 16, 128>}]} {
    %c0 = arith.constant 0 : index
    %c0_0 = arith.constant 0 : index
    %0 = vector.load %arg1[%c0, %c0_0] : memref<16x8xf32, #tpu.memory_space<vmem>>, vector<16x8xf32>
    %c0_1 = arith.constant 0 : index
    %c0_2 = arith.constant 0 : index
    %1 = vector.load %arg2[%c0_1, %c0_2] : memref<8x128xf32, #tpu.memory_space<vmem>>, vector<8x128xf32>
    %cst = arith.constant dense<0.000000e+00> : vector<16x128xf32>
    %2 = tpu.matmul %0, %1, %cst {dimension_numbers = #tpu.dot_dimension_numbers<[1], [0], [0], [1], [0, 0, 1, 1], [], []>} : vector<16x8xf32>, vector<8x128xf32>, vector<16x128xf32> -> vector<16x128xf32>
    %c0_3 = arith.constant 0 : index
    %c0_4 = arith.constant 0 : index
    %3 = vector.load %arg3[%c0_3, %c0_4] : memref<1x128xf32, #tpu.memory_space<vmem>>, vector<1x128xf32>
    %4 = vector.broadcast %3 : vector<1x128xf32> to vector<16x128xf32>
    %5 = arith.addf %2, %4 : vector<16x128xf32>
    %c0_5 = arith.constant 0 : index
    %c0_6 = arith.constant 0 : index
    %6 = vector.load %arg4[%c0_5, %c0_6] : memref<16x128xf32, #tpu.memory_space<vmem>>, vector<16x128xf32>
    tpu.vector_store %arg4[%c0_5, %c0_6], %5 {strides = array<i32>} : memref<16x128xf32, #tpu.memory_space<vmem>>, vector<16x128xf32>,
    return
  }
  func.func @transform_0(%arg0: i32) -> (i32, i32) {
    %c0_i32 = arith.constant 0 : i32
    %c0_i32_0 = arith.constant 0 : i32
    return %arg0, %c0_i32 : i32, i32
  }
  func.func @transform_1(%arg0: i32) -> (i32, i32) {
    %c0_i32 = arith.constant 0 : i32
    %c0_i32_0 = arith.constant 0 : i32
    %c0_i32_1 = arith.constant 0 : i32
    return %c0_i32, %c0_i32_0 : i32, i32
  }
  func.func @transform_2(%arg0: i32) -> (i32, i32) {
    %c0_i32 = arith.constant 0 : i32
    %c0_i32_0 = arith.constant 0 : i32
    %c0_i32_1 = arith.constant 0 : i32
    return %c0_i32, %c0_i32_0 : i32, i32
  }
  func.func @transform_3(%arg0: i32) -> (i32, i32) {
    %c0_i32 = arith.constant 0 : i32
    %c0_i32_0 = arith.constant 0 : i32
    return %arg0, %c0_i32 : i32, i32
  }
}

</mosaic_0001>

<bundles_post_ra>
// kernel: tpu_custom_call.1
= control target key start
LH: loop header
LB: loop body
LE: loop exit
PB: predicated region body
PF: predicated region fallthrough
CT: control target
= control target key end

     0   :  { %vm22_vm0 = vcmask 64512   ;;  %s143_s0 = inlined_call_operand.vmem [shape: f32[16,8], index: 0, kind: input, shape index: {}]   ;;  %s144_s1 = inlined_call_operand.vmem [shape: f32[8,128], index: 1, kind: input, shape index: {}]   ;;  %s145_s2 = inlined_call_operand.vmem [shape: f32[1,128], index: 2, kind: input, shape index: {}]   ;;  %s146_s3 = inlined_call_operand.hbm [shape: f32[16,128], index: 3, kind: output, shape index: {}]  }
   0x1   :  { %v17_v0 = vld [vmem:[%s144_s1] sm:$0xff]  ;;  %v16_v2 = vld [vmem:[%s143_s0 + $0x8] sm:$0xff] }
   0x2   :  { %v15_v1 = vld [vmem:[%s143_s0] sm:$0xff]  ;;  %44 = vmatpush.msra.mxu0 %v17_v0  ;;  %74 = vmatpush.msra.mxu1 %v17_v0 }
   0x3   :  { %8 = vsyncpa [#allocation3], 0  ;;  %72 = vmatmul.msk.f32.vlgmr.msra.gmra.mxu0 %vm22_vm0, %v15_v1  ;;  %73 = vmatmul.msk.f32.vlgmr.msra.gmra.mxu1 %vm22_vm0, %v16_v2  ;;  %v78_v3 = vld [vmem:[%s145_s2] ss:$0 sm:$0xff]  ;;  %s105_s20 = smov [#allocation2]   ;;  %s60_s23 = sshll.u32 %s146_s3, 4  ;;  %s61_s23 = int_to_ptr.hbm [resolvable:$true] %s60_s23 }
   0x4   :  { %s58_s1 = sshll.u32 %s105_s20, 4  ;;  %s106_s0 = smov 128   ;;  %s59_s1 = int_to_ptr.vmem [resolvable:$true] %s58_s1 }
   0x5   :  { %s107_s24 = smov 8  }
  0x80   :  { %v46_v4 = vpop.f32.mrf.mxu0  ;;  %v49_v5 = vpop.f32.mrf.mxu1 }
  0x81   :  { %v47_v6 = vadd.f32 %v78_v3, %v46_v4  ;;  %v50_v7 = vadd.f32 %v78_v3, %v49_v5 }
  0x83   :  { %52 = vst [vmem:[#allocation2] sm:$0xff] %v47_v6 }
  0x84   :  { %53 = vst [vmem:[#allocation2 + $0x8] sm:$0xff] %v50_v7 }
  0x85   :  { %66 = dma.vmem_to_hbm [thread:$0]  %s59_s1, 256, %s61_s23, [#allocation3], %s106_s0, %s106_s0, %s107_s24  }
  0x86   :  { %103 = dma.done.wait [#allocation3], 256  }
  0x87   :  { %104 = vsyncadd [#allocation3], 4294967040 }
  0x88   :  { %71 = vsyncpa [#allocation3], 1 }

</bundles_post_ra>
